<compile_context>
chip_gen: v7x
topology: tpu7x:2x2x1
jax: 0.10.0
libtpu: 0.0.40
codegen_flags: <defaults>
</compile_context>

<pallas_src>
import math
import functools

import jax
import jax.numpy as jnp
from jax import lax
from jax.experimental import pallas as pl
from jax.experimental.pallas import tpu as pltpu


# ---------------------------------------------------------------------------
# Kernel 1: per-head fused Q/K/V projections (Q pre-scaled by 1/sqrt(head_dim)).
# Grid = (batch, s-tiles, heads); x tile stays resident across the head axis, per-head
# (E, D) weight panels stream. Outputs are written lane-dense into (B, H, S, D).
# ---------------------------------------------------------------------------
def qkv_proj_kernel(x_ref, wq_ref, bq_ref, wk_ref, bk_ref, wv_ref, bv_ref,
                    q_ref, k_ref, v_ref, *, inv_scale):
    x = x_ref[0]                                                         # (TS, E)
    q = jnp.dot(x, wq_ref[0], preferred_element_type=jnp.float32) + bq_ref[0, 0]
    k = jnp.dot(x, wk_ref[0], preferred_element_type=jnp.float32) + bk_ref[0, 0]
    v = jnp.dot(x, wv_ref[0], preferred_element_type=jnp.float32) + bv_ref[0, 0]
    q_ref[0, 0] = (q * inv_scale).astype(q_ref.dtype)   # fold 1/sqrt(D): S*E muls
    k_ref[0, 0] = k.astype(k_ref.dtype)
    v_ref[0, 0] = v.astype(v_ref.dtype)


# ---------------------------------------------------------------------------
# Kernel 2: flash attention (online softmax over k tiles) + fused output projection.
# Grid = (batch, q-tiles, heads, k-tiles); heads & k-tiles are reduction ("arbitrary")
# axes. Per-head context (TQ, D) is lane-dense; the (TQ, E) output-projection
# accumulator is built up across heads and stored once, lane-dense.
# ---------------------------------------------------------------------------
def flash_attn_kernel(q_ref, k_ref, v_ref, wo_ref, bo_ref, o_ref,
                      m_ref, l_ref, acc_ref, oacc_ref):
    h = pl.program_id(2)
    ki = pl.program_id(3)
    nh = pl.num_programs(2)
    nk = pl.num_programs(3)

    @pl.when(jnp.logical_and(h == 0, ki == 0))
    def _init_output():
        oacc_ref[...] = jnp.zeros_like(oacc_ref)

    @pl.when(ki == 0)
    def _init_head():
        m_ref[...] = jnp.full_like(m_ref, -jnp.inf)
        l_ref[...] = jnp.zeros_like(l_ref)
        acc_ref[...] = jnp.zeros_like(acc_ref)

    q = q_ref[0, 0]                                  # (TQ, D), already * 1/sqrt(D)
    k = k_ref[0, 0]                                  # (TK, D)
    v = v_ref[0, 0]                                  # (TK, D)

    # Q @ K^T without materializing K^T (contract the last dims).
    s = lax.dot_general(q, k, (((1,), (1,)), ((), ())),
                        preferred_element_type=jnp.float32)              # (TQ, TK)

    m_prev = m_ref[...]                                                  # (TQ, 1)
    m_new = jnp.maximum(m_prev, jnp.max(s, axis=-1, keepdims=True))
    alpha = jnp.exp(m_prev - m_new)                                      # (TQ, 1)
    p = jnp.exp(s - m_new)                                               # (TQ, TK) f32

    # TODO(synk): if a bundle trace shows the XLU reductions binding, offload the row
    #             sum of p to the MXU (fold a ones column into the P@V matmul).
    l_ref[...] = alpha * l_ref[...] + jnp.sum(p, axis=-1, keepdims=True)
    acc_ref[...] = alpha * acc_ref[...] + jnp.dot(
        p.astype(v.dtype), v, preferred_element_type=jnp.float32)
    m_ref[...] = m_new

    @pl.when(ki == nk - 1)
    def _head_done():
        # Exact reciprocal: runs once per (q-tile, head), cost negligible.
        ctx = acc_ref[...] / l_ref[...]                                  # (TQ, D)
        oacc_ref[...] += jnp.dot(ctx.astype(wo_ref.dtype), wo_ref[0],
                                 preferred_element_type=jnp.float32)     # + ctx_h @ Wo_h

    @pl.when(jnp.logical_and(h == nh - 1, ki == nk - 1))
    def _finalize():
        o_ref[0] = (oacc_ref[...] + bo_ref[...]).astype(o_ref.dtype)


# ---------------------------------------------------------------------------
# Helpers.
# ---------------------------------------------------------------------------
def _vmem_limit_bytes():
    """Generation-aware VMEM budget: ~96 MiB on 128-MiB parts, 48 MiB on 64-MiB v7x."""
    try:
        info = pltpu.get_tpu_info()
        cap = getattr(info, "vmem_capacity_bytes", None)
    except Exception:
        cap = None
    if cap is None:
        cap = 64 * 1024 * 1024          # conservative: assume the smallest (v7x)
    return cap, min(int(cap) * 3 // 4, 100 * 1024 * 1024)


def _pick_tile(dim, max_tile, align):
    """Largest divisor of `dim` that is <= max_tile and a multiple of `align`."""
    if dim <= max_tile:
        return dim
    for t in range(max_tile, align - 1, -1):
        if dim % t == 0 and t % align == 0:
            return t
    # TODO(synk): ragged-tail handling; awkward dims fall back to any divisor >= 8.
    for t in range(max_tile, 7, -1):
        if dim % t == 0:
            return t
    return dim


def multi_head_self_attention(x, params, num_heads, *, compute_dtype=jnp.float32,
                              s_tile=None, q_tile=None, k_tile=None):
    """x: (B, S, E). params: pre-transposed (E_in, E_out) weights + (E,) biases."""
    B, S, E = x.shape
    assert E % num_heads == 0
    H = num_heads
    D = E // H
    inv_scale = 1.0 / math.sqrt(D)
    f32 = jnp.float32

    cd = compute_dtype                       # bf16 halves weight/QKV VMEM & HBM traffic
    # bf16 packs 16 rows per sublane tile; keep second-minor tiles 16-aligned there.
    align = 16 if jnp.dtype(cd).itemsize <= 2 else 8

    vmem_cap, vmem_limit = _vmem_limit_bytes()
    big_vmem = vmem_cap >= 100 * 1024 * 1024           # v5e/v6e (128 MiB) vs v7x (64 MiB)

    if s_tile is None:
        s_tile = 512
    if k_tile is None:
        k_tile = 1024                                  # big k tiles amortize softmax work
    if q_tile is None:
        q_tile = 512 if big_vmem else 256

    TS = _pick_tile(S, s_tile, align)
    TQ = _pick_tile(S, q_tile, align)
    TK = _pick_tile(S, k_tile, align)
    # v7x has two TensorCores: keep the parallel grid extent (B * S//TQ) >= 2 if possible.
    if B * (S // TQ) < 2 and S >= 2 * align:
        TQ = _pick_tile(S, max(align, S // 2), align)
    assert S % TS == 0 and S % TQ == 0 and S % TK == 0

    # Weights pre-reshaped head-major outside the kernels (pure layout plumbing) so every
    # kernel block has a full, lane-dense last dim.
    xc = x.astype(cd)
    wq = params['wq_t'].reshape(E, H, D).transpose(1, 0, 2).astype(cd)    # (H, E, D)
    wk = params['wk_t'].reshape(E, H, D).transpose(1, 0, 2).astype(cd)
    wv = params['wv_t'].reshape(E, H, D).transpose(1, 0, 2).astype(cd)
    wo = params['wo_t'].reshape(H, D, E).astype(cd)                       # (H, D, E)
    bq = params['bq'].reshape(H, 1, D).astype(f32)
    bk = params['bk'].reshape(H, 1, D).astype(f32)
    bv = params['bv'].reshape(H, 1, D).astype(f32)
    bo = params['bo'].reshape(1, E).astype(f32)

    # ---- 1) per-head Q/K/V projections ------------------------------------------------
    x_spec = pl.BlockSpec((1, TS, E), lambda b, si, h: (b, si, 0))   # resident across h
    w_spec = pl.BlockSpec((1, E, D), lambda b, si, h: (h, 0, 0))     # per-head weight panel
    b_spec = pl.BlockSpec((1, 1, D), lambda b, si, h: (h, 0, 0))
    qkv_spec = pl.BlockSpec((1, 1, TS, D), lambda b, si, h: (b, h, si, 0))
    qkv_struct = jax.ShapeDtypeStruct((B, H, S, D), cd)

    q, k, v = pl.pallas_call(
        functools.partial(qkv_proj_kernel, inv_scale=inv_scale),
        out_shape=(qkv_struct, qkv_struct, qkv_struct),
        grid_spec=pltpu.PrefetchScalarGridSpec(
            num_scalar_prefetch=0,
            grid=(B, S // TS, H),
            in_specs=[x_spec, w_spec, b_spec, w_spec, b_spec, w_spec, b_spec],
            out_specs=[qkv_spec, qkv_spec, qkv_spec],
        ),
        compiler_params=pltpu.CompilerParams(
            dimension_semantics=("parallel", "parallel", "parallel"),
            vmem_limit_bytes=vmem_limit),
    )(xc, wq, bq, wk, bk, wv, bv)

    # ---- 2) flash attention + fused output projection ---------------------------------
    out = pl.pallas_call(
        flash_attn_kernel,
        out_shape=jax.ShapeDtypeStruct((B, S, E), x.dtype),
        grid_spec=pltpu.PrefetchScalarGridSpec(
            num_scalar_prefetch=0,
            grid=(B, S // TQ, H, S // TK),              # reduction axes (head, k) last
            in_specs=[
                pl.BlockSpec((1, 1, TQ, D), lambda b, qi, h, ki: (b, h, qi, 0)),   # Q
                pl.BlockSpec((1, 1, TK, D), lambda b, qi, h, ki: (b, h, ki, 0)),   # K
                pl.BlockSpec((1, 1, TK, D), lambda b, qi, h, ki: (b, h, ki, 0)),   # V
                pl.BlockSpec((1, D, E), lambda b, qi, h, ki: (h, 0, 0)),           # Wo_h
                pl.BlockSpec((1, E), lambda b, qi, h, ki: (0, 0),
                             pipeline_mode=pl.Buffered(1)),                        # bo
            ],
            out_specs=pl.BlockSpec((1, TQ, E), lambda b, qi, h, ki: (b, qi, 0)),
            scratch_shapes=[
                pltpu.VMEM((TQ, 1), f32),    # running max  m
                pltpu.VMEM((TQ, 1), f32),    # running sum  l
                pltpu.VMEM((TQ, D), f32),    # per-head context accumulator (lane-dense)
                pltpu.VMEM((TQ, E), f32),    # output-projection accumulator (lane-dense)
            ],
        ),
        compiler_params=pltpu.CompilerParams(
            dimension_semantics=("parallel", "parallel", "arbitrary", "arbitrary"),
            vmem_limit_bytes=vmem_limit),
    )(q, k, v, wo, bo)
    return out


def init_params(key, embed_dim):
    """Deterministic init; weights stored pre-transposed (in, out) like torch Linear^T."""
    keys = jax.random.split(key, 8)
    bound = 1.0 / math.sqrt(embed_dim)

    def w(kk):
        return jax.random.uniform(kk, (embed_dim, embed_dim), jnp.float32, -bound, bound)

    def b(kk):
        return jax.random.uniform(kk, (embed_dim,), jnp.float32, -bound, bound)

    return {
        'wq_t': w(keys[0]), 'bq': b(keys[1]),
        'wk_t': w(keys[2]), 'bk': b(keys[3]),
        'wv_t': w(keys[4]), 'bv': b(keys[5]),
        'wo_t': w(keys[6]), 'bo': b(keys[7]),
    }


def reference_mhsa(x, params, num_heads):
    """Plain-JAX reference mirroring the PyTorch forward (mask=None)."""
    B, S, E = x.shape
    D = E // num_heads
    scale = math.sqrt(D)

    def proj(w_t, b):
        return x @ w_t + b

    q = proj(params['wq_t'], params['bq']).reshape(B, S, num_heads, D).transpose(0, 2, 1, 3)
    k = proj(params['wk_t'], params['bk']).reshape(B, S, num_heads, D).transpose(0, 2, 1, 3)
    v = proj(params['wv_t'], params['bv']).reshape(B, S, num_heads, D).transpose(0, 2, 1, 3)
    scores = jnp.einsum('bhqd,bhkd->bhqk', q, k) / scale
    attn = jax.nn.softmax(scores, axis=-1)
    ctx = jnp.einsum('bhqk,bhkd->bhqd', attn, v).transpose(0, 2, 1, 3).reshape(B, S, E)
    return ctx @ params['wo_t'] + params['bo']


if __name__ == "__main__":
    B, S, E, H = 2, 8, 32, 4

    key = jax.random.PRNGKey(0)
    kx, kp = jax.random.split(key)
    x = jax.random.normal(kx, (B, S, E), dtype=jnp.float32)
    params = init_params(kp, E)

    ref = reference_mhsa(x, params, H)

    # Default f32 path (v5e keeps all elementwise math in f32).
    out = jax.block_until_ready(multi_head_self_attention(x, params, H))
    assert out.shape == (B, S, E)
    assert jnp.allclose(out, ref, atol=5e-3, rtol=5e-3), "f32 kernel mismatch vs reference"

    # bf16 MXU-input path (v6e/v7x): bf16 matmul inputs, f32 accumulation + f32 softmax.
    out_bf16 = jax.block_until_ready(
        multi_head_self_attention(x, params, H, compute_dtype=jnp.bfloat16))
    assert jnp.allclose(out_bf16, ref, atol=5e-2, rtol=5e-2), "bf16 kernel mismatch vs reference"

    print("KERNEL_OK")
</pallas_src>

<mosaic_0001>
module attributes {stable_mosaic.version = 11 : i64} {
  func.func @qkv_proj_kernel(%arg0: i32, %arg1: i32, %arg2: i32, %arg3: memref<1x8x32xf32, #tpu.memory_space<vmem>>, %arg4: memref<1x32x8xf32, #tpu.memory_space<vmem>>, %arg5: memref<1x1x8xf32, #tpu.memory_space<vmem>>, %arg6: memref<1x32x8xf32, #tpu.memory_space<vmem>>, %arg7: memref<1x1x8xf32, #tpu.memory_space<vmem>>, %arg8: memref<1x32x8xf32, #tpu.memory_space<vmem>>, %arg9: memref<1x1x8xf32, #tpu.memory_space<vmem>>, %arg10: memref<1x1x8x8xf32, #tpu.memory_space<vmem>>, %arg11: memref<1x1x8x8xf32, #tpu.memory_space<vmem>>, %arg12: memref<1x1x8x8xf32, #tpu.memory_space<vmem>>) attributes {dimension_semantics = [#tpu.dimension_semantics<parallel>, #tpu.dimension_semantics<parallel>, #tpu.dimension_semantics<parallel>], iteration_bounds = array<i64: 2, 1, 4>, scalar_prefetch = 0 : i64, scratch_operands = 0 : i64, tpu.core_type = #tpu.core_type<tc>, window_params = [{transform_indices = @transform_0, window_bounds = array<i64: 1, 8, 32>}, {transform_indices = @transform_1, window_bounds = array<i64: 1, 32, 8>}, {transform_indices = @transform_2, window_bounds = array<i64: 1, 1, 8>}, {transform_indices = @transform_3, window_bounds = array<i64: 1, 32, 8>}, {transform_indices = @transform_4, window_bounds = array<i64: 1, 1, 8>}, {transform_indices = @transform_5, window_bounds = array<i64: 1, 32, 8>}, {transform_indices = @transform_6, window_bounds = array<i64: 1, 1, 8>}, {transform_indices = @transform_7, window_bounds = array<i64: 1, 1, 8, 8>}, {transform_indices = @transform_8, window_bounds = array<i64: 1, 1, 8, 8>}, {transform_indices = @transform_9, window_bounds = array<i64: 1, 1, 8, 8>}]} {
    %c0 = arith.constant 0 : index
    %c0_0 = arith.constant 0 : index
    %c0_1 = arith.constant 0 : index
    %0 = vector.load %arg3[%c0, %c0_0, %c0_1] : memref<1x8x32xf32, #tpu.memory_space<vmem>>, vector<1x8x32xf32>
    %1 = vector.shape_cast %0 : vector<1x8x32xf32> to vector<8x32xf32>
    %c0_2 = arith.constant 0 : index
    %c0_3 = arith.constant 0 : index
    %c0_4 = arith.constant 0 : index
    %2 = vector.load %arg4[%c0_2, %c0_3, %c0_4] : memref<1x32x8xf32, #tpu.memory_space<vmem>>, vector<1x32x8xf32>
    %3 = vector.shape_cast %2 : vector<1x32x8xf32> to vector<32x8xf32>
    %cst = arith.constant dense<0.000000e+00> : vector<8x8xf32>
    %4 = tpu.matmul %1, %3, %cst {dimension_numbers = #tpu.dot_dimension_numbers<[1], [0], [0], [1], [0, 0, 1, 1], [], []>} : vector<8x32xf32>, vector<32x8xf32>, vector<8x8xf32> -> vector<8x8xf32>
    %c0_5 = arith.constant 0 : index
    %c0_6 = arith.constant 0 : index
    %c0_7 = arith.constant 0 : index
    %5 = vector.load %arg5[%c0_5, %c0_6, %c0_7] : memref<1x1x8xf32, #tpu.memory_space<vmem>>, vector<1x1x8xf32>
    %6 = vector.shape_cast %5 : vector<1x1x8xf32> to vector<8xf32>
    %7 = vector.shape_cast %6 : vector<8xf32> to vector<1x8xf32>
    %8 = vector.broadcast %7 : vector<1x8xf32> to vector<8x8xf32>
    %9 = arith.addf %4, %8 : vector<8x8xf32>
    %c0_8 = arith.constant 0 : index
    %c0_9 = arith.constant 0 : index
    %c0_10 = arith.constant 0 : index
    %10 = vector.load %arg6[%c0_8, %c0_9, %c0_10] : memref<1x32x8xf32, #tpu.memory_space<vmem>>, vector<1x32x8xf32>
    %11 = vector.shape_cast %10 : vector<1x32x8xf32> to vector<32x8xf32>
    %cst_11 = arith.constant dense<0.000000e+00> : vector<8x8xf32>
    %12 = tpu.matmul %1, %11, %cst_11 {dimension_numbers = #tpu.dot_dimension_numbers<[1], [0], [0], [1], [0, 0, 1, 1], [], []>} : vector<8x32xf32>, vector<32x8xf32>, vector<8x8xf32> -> vector<8x8xf32>
    %c0_12 = arith.constant 0 : index
    %c0_13 = arith.constant 0 : index
    %c0_14 = arith.constant 0 : index
    %13 = vector.load %arg7[%c0_12, %c0_13, %c0_14] : memref<1x1x8xf32, #tpu.memory_space<vmem>>, vector<1x1x8xf32>
    %14 = vector.shape_cast %13 : vector<1x1x8xf32> to vector<8xf32>
    %15 = vector.shape_cast %14 : vector<8xf32> to vector<1x8xf32>
    %16 = vector.broadcast %15 : vector<1x8xf32> to vector<8x8xf32>
    %17 = arith.addf %12, %16 : vector<8x8xf32>
    %c0_15 = arith.constant 0 : index
    %c0_16 = arith.constant 0 : index
    %c0_17 = arith.constant 0 : index
    %18 = vector.load %arg8[%c0_15, %c0_16, %c0_17] : memref<1x32x8xf32, #tpu.memory_space<vmem>>, vector<1x32x8xf32>
    %19 = vector.shape_cast %18 : vector<1x32x8xf32> to vector<32x8xf32>
    %cst_18 = arith.constant dense<0.000000e+00> : vector<8x8xf32>
    %20 = tpu.matmul %1, %19, %cst_18 {dimension_numbers = #tpu.dot_dimension_numbers<[1], [0], [0], [1], [0, 0, 1, 1], [], []>} : vector<8x32xf32>, vector<32x8xf32>, vector<8x8xf32> -> vector<8x8xf32>
    %c0_19 = arith.constant 0 : index
    %c0_20 = arith.constant 0 : index
    %c0_21 = arith.constant 0 : index
    %21 = vector.load %arg9[%c0_19, %c0_20, %c0_21] : memref<1x1x8xf32, #tpu.memory_space<vmem>>, vector<1x1x8xf32>
    %22 = vector.shape_cast %21 : vector<1x1x8xf32> to vector<8xf32>
    %23 = vector.shape_cast %22 : vector<8xf32> to vector<1x8xf32>
    %24 = vector.broadcast %23 : vector<1x8xf32> to vector<8x8xf32>
    %25 = arith.addf %20, %24 : vector<8x8xf32>
    %cst_22 = arith.constant 0.353553385 : f32
    %26 = vector.broadcast %cst_22 : f32 to vector<8x8xf32>
    %27 = arith.mulf %9, %26 : vector<8x8xf32>
    %c0_23 = arith.constant 0 : index
    %c0_24 = arith.constant 0 : index
    %c0_25 = arith.constant 0 : index
    %c0_26 = arith.constant 0 : index
    %28 = vector.load %arg10[%c0_23, %c0_24, %c0_25, %c0_26] : memref<1x1x8x8xf32, #tpu.memory_space<vmem>>, vector<1x1x8x8xf32>
    %29 = vector.shape_cast %28 : vector<1x1x8x8xf32> to vector<8x8xf32>
    %30 = vector.shape_cast %27 : vector<8x8xf32> to vector<1x1x8x8xf32>
    tpu.vector_store %arg10[%c0_23, %c0_24, %c0_25, %c0_26], %30 {strides = array<i32>} : memref<1x1x8x8xf32, #tpu.memory_space<vmem>>, vector<1x1x8x8xf32>,
    %c0_27 = arith.constant 0 : index
    %c0_28 = arith.constant 0 : index
    %c0_29 = arith.constant 0 : index
    %c0_30 = arith.constant 0 : index
    %31 = vector.load %arg11[%c0_27, %c0_28, %c0_29, %c0_30] : memref<1x1x8x8xf32, #tpu.memory_space<vmem>>, vector<1x1x8x8xf32>
    %32 = vector.shape_cast %31 : vector<1x1x8x8xf32> to vector<8x8xf32>
    %33 = vector.shape_cast %17 : vector<8x8xf32> to vector<1x1x8x8xf32>
    tpu.vector_store %arg11[%c0_27, %c0_28, %c0_29, %c0_30], %33 {strides = array<i32>} : memref<1x1x8x8xf32, #tpu.memory_space<vmem>>, vector<1x1x8x8xf32>,
    %c0_31 = arith.constant 0 : index
    %c0_32 = arith.constant 0 : index
    %c0_33 = arith.constant 0 : index
    %c0_34 = arith.constant 0 : index
    %34 = vector.load %arg12[%c0_31, %c0_32, %c0_33, %c0_34] : memref<1x1x8x8xf32, #tpu.memory_space<vmem>>, vector<1x1x8x8xf32>
    %35 = vector.shape_cast %34 : vector<1x1x8x8xf32> to vector<8x8xf32>
    %36 = vector.shape_cast %25 : vector<8x8xf32> to vector<1x1x8x8xf32>
    tpu.vector_store %arg12[%c0_31, %c0_32, %c0_33, %c0_34], %36 {strides = array<i32>} : memref<1x1x8x8xf32, #tpu.memory_space<vmem>>, vector<1x1x8x8xf32>,
    return
  }
  func.func @transform_0(%arg0: i32, %arg1: i32, %arg2: i32) -> (i32, i32, i32) {
    %c0_i32 = arith.constant 0 : i32
    %c0_i32_0 = arith.constant 0 : i32
    return %arg0, %arg1, %c0_i32 : i32, i32, i32
  }
  func.func @transform_1(%arg0: i32, %arg1: i32, %arg2: i32) -> (i32, i32, i32) {
    %c0_i32 = arith.constant 0 : i32
    %c0_i32_0 = arith.constant 0 : i32
    %c0_i32_1 = arith.constant 0 : i32
    return %arg2, %c0_i32, %c0_i32_0 : i32, i32, i32
  }
  func.func @transform_2(%arg0: i32, %arg1: i32, %arg2: i32) -> (i32, i32, i32) {
    %c0_i32 = arith.constant 0 : i32
    %c0_i32_0 = arith.constant 0 : i32
    %c0_i32_1 = arith.constant 0 : i32
    return %arg2, %c0_i32, %c0_i32_0 : i32, i32, i32
  }
  func.func @transform_3(%arg0: i32, %arg1: i32, %arg2: i32) -> (i32, i32, i32) {
    %c0_i32 = arith.constant 0 : i32
    %c0_i32_0 = arith.constant 0 : i32
    %c0_i32_1 = arith.constant 0 : i32
    return %arg2, %c0_i32, %c0_i32_0 : i32, i32, i32
  }
  func.func @transform_4(%arg0: i32, %arg1: i32, %arg2: i32) -> (i32, i32, i32) {
    %c0_i32 = arith.constant 0 : i32
    %c0_i32_0 = arith.constant 0 : i32
    %c0_i32_1 = arith.constant 0 : i32
    return %arg2, %c0_i32, %c0_i32_0 : i32, i32, i32
  }
  func.func @transform_5(%arg0: i32, %arg1: i32, %arg2: i32) -> (i32, i32, i32) {
    %c0_i32 = arith.constant 0 : i32
    %c0_i32_0 = arith.constant 0 : i32
    %c0_i32_1 = arith.constant 0 : i32
    return %arg2, %c0_i32, %c0_i32_0 : i32, i32, i32
  }
  func.func @transform_6(%arg0: i32, %arg1: i32, %arg2: i32) -> (i32, i32, i32) {
    %c0_i32 = arith.constant 0 : i32
    %c0_i32_0 = arith.constant 0 : i32
    %c0_i32_1 = arith.constant 0 : i32
    return %arg2, %c0_i32, %c0_i32_0 : i32, i32, i32
  }
  func.func @transform_7(%arg0: i32, %arg1: i32, %arg2: i32) -> (i32, i32, i32, i32) {
    %c0_i32 = arith.constant 0 : i32
    %c0_i32_0 = arith.constant 0 : i32
    return %arg0, %arg2, %arg1, %c0_i32 : i32, i32, i32, i32
  }
  func.func @transform_8(%arg0: i32, %arg1: i32, %arg2: i32) -> (i32, i32, i32, i32) {
    %c0_i32 = arith.constant 0 : i32
    %c0_i32_0 = arith.constant 0 : i32
    return %arg0, %arg2, %arg1, %c0_i32 : i32, i32, i32, i32
  }
  func.func @transform_9(%arg0: i32, %arg1: i32, %arg2: i32) -> (i32, i32, i32, i32) {
    %c0_i32 = arith.constant 0 : i32
    %c0_i32_0 = arith.constant 0 : i32
    return %arg0, %arg2, %arg1, %c0_i32 : i32, i32, i32, i32
  }
}

</mosaic_0001>

<bundles_post_ra>
// kernel: tpu_custom_call.1
= control target key start
LH: loop header
LB: loop body
LE: loop exit
PB: predicated region body
PF: predicated region fallthrough
CT: control target
= control target key end

     0   :  { %s1670_s0 = inlined_call_operand.vmem [shape: f32[2,8,32], index: 0, kind: input, shape index: {}]   ;;  %s1671_s1 = inlined_call_operand.vmem [shape: f32[4,32,8], index: 1, kind: input, shape index: {}]   ;;  %s1672_s2 = inlined_call_operand.vmem [shape: f32[4,1,8], index: 2, kind: input, shape index: {}]   ;;  %s1673_s3 = inlined_call_operand.vmem [shape: f32[4,32,8], index: 3, kind: input, shape index: {}]   ;;  %s1674_s4 = inlined_call_operand.vmem [shape: f32[4,1,8], index: 4, kind: input, shape index: {}]   ;;  %s1675_s5 = inlined_call_operand.vmem [shape: f32[4,32,8], index: 5, kind: input, shape index: {}]   ;;  %s1676_s6 = inlined_call_operand.vmem [shape: f32[4,1,8], index: 6, kind: input, shape index: {}]   ;;  %s1677_s7 = inlined_call_operand.hbm [shape: f32[2,4,8,8], index: 7, kind: output, shape index: {0}]   ;;  %s1678_s8 = inlined_call_operand.hbm [shape: f32[2,4,8,8], index: 8, kind: output, shape index: {1}]   ;;  %s1679_s9 = inlined_call_operand.hbm [shape: f32[2,4,8,8], index: 9, kind: output, shape index: {2}]  }
   0x1   :  { %1689 = sst [smem:[#allocation14_spill]] %s1670_s0 }
   0x2   :  { %1690 = sst [smem:[#allocation15_spill]] %s1671_s1 }
   0x3   :  { %1691 = sst [smem:[#allocation16_spill]] %s1672_s2 }
   0x4   :  { %1692 = sst [smem:[#allocation17_spill]] %s1673_s3 }
   0x5   :  { %1693 = sst [smem:[#allocation18_spill]] %s1674_s4 }
   0x6   :  { %15 = vsyncpa [#allocation3], 0 }
   0x7   :  { %17 = vsyncpa [#allocation3 + $0x1], 0 }
   0x8   :  { %18 = vsyncpa [#allocation5], 0 }
   0x9   :  { %20 = vsyncpa [#allocation5 + $0x1], 0  ;;  %s1408_s30 = smov 0   ;;  %s1410_s10 = smov 0  }
   0xa   :  { %s1412_s11 = smov 0   ;;  %s1414_s12 = smov 0  }
   0xb   :  { %s1416_s13 = smov 0   ;;  %s1418_s14 = smov 0  }
   0xc   :  { %s1420_s15 = smov 0   ;;  %s1422_s16 = smov 0  }
   0xd LB: > { %1694 = sst [smem:[#allocation9_spill]] %s1342_s14  ;;  %s1681_s17 = sadd.s32 4294967295, %s1350_s16   ;;  %s1350_s16 = sphi %s1422_s16, %s26_s16   ;;  %s1346_s15 = sphi %s1420_s15, %s1718_s15   ;;  %s1342_s14 = sphi %s1418_s14, %s1717_s14   ;;  %s1338_s13 = sphi %s1416_s13, %s1716_s13   ;;  %s1334_s12 = sphi %s1414_s12, %s1715_s12   ;;  %s1330_s11 = sphi %s1412_s11, %s1721_s11   ;;  %s1326_s10 = sphi %s1410_s10, %s1720_s10   ;;  %s1322_s30 = sphi %s1408_s30, %s1719_s30  }
   0xe   : > { %1695 = sst [smem:[#allocation10_spill]] %s1346_s15  ;;  %s1680_s18 = sadd.s32 4294967294, %s1350_s16  }
   0xf   : > { %s38_s19 = sadd.s32 1, %s1342_s14  ;;  %s45_s20 = sadd.s32 1, %s1346_s15 }
  0x10   : > { %p39_p0 = scmp.ge.s32.totalorder %s38_s19, 4  ;;  %p250_p1 = scmp.ne.s32.totalorder %s1330_s11, %s1326_s10 }
  0x11   : > { %p251_p2 = scmp.eq.s32.totalorder %s1681_s17, 7  ;;  %p256_p5 = scmp.ne.s32.totalorder %s1326_s10, %s1322_s30 }
  0x12   : > { %s1723_s19 = smov (%p39_p0, %s38_s19), 0  ;;  %s1725_s20 = smov (!%p39_p0, %s45_s20), %s1346_s15 }
  0x13   : > { %1696 = sst [smem:[#allocation11_spill]] %s1723_s19  ;;  %s234_s21 = ssub.s32 %s1342_s14, %s1723_s19 }
  0x14   : > { %p1461_p3 = por %p251_p2, %p250_p1  ;;  %p47_p4 = scmp.ge.s32.totalorder %s1725_s20, 2 }
  0x15   : > { %p257_p6 = scmp.eq.s32.totalorder %s1680_s18, 7  ;;  %p1015_p7 = scmp.ge.s32.totalorder %s1350_s16, 1 }
  0x16   : > { %s1727_s20 = smov (%p47_p4, %s1725_s20), 0  ;;  %p387_p9 = scmp.lt.s32.totalorder %s1350_s16, 9 }
  0x17   : > { %1698 = sst [smem:[#allocation12_spill]] %s1727_s20  ;;  %p1472_p8 = por %p257_p6, %p256_p5 }
  0x18   : > { %s233_s24 = ssub.s32 %s1346_s15, %s1727_s20  ;;  %s240_s25 = sadd.s32 1, %s1330_s11 }
  0x19   : > { %s235_s26 = sor.u32 %s234_s21, %s233_s24  ;;  %p388_p10 = pnand %p1015_p7, %p387_p9 }
  0x1a   : > { %p238_p11 = scmp.eq.s32.totalorder %s235_s26, 0  ;;  %p466_p12 = scmp.lt.s32.totalorder (!%p388_p10), %s1334_s12, 3  ;;  %v1352_v0 = vmov (!%p388_p10), 0.0|0.0   ;;  %vm1353_vm0 = vmmov (!%p388_p10), 0   ;;  %v1354_v1 = vmov (!%p388_p10), 0.0   ;;  %vm502_vm1 = vcmask (!%p388_p10), 261120  }
  0x1b   : > { %391 = sbr.rel (%p388_p10) target bundleno = 326 (0x146), region = 48  ;;  %p459_p13 = scmp.lt.s32.totalorder (!%p388_p10), %s1338_s13, 1  ;;  %1094 = vmatprep.subr.bf16.mxu0 (!%p388_p10), %v1352_v0  ;;  %1100 = vmatprep.subr.bf16.mxu1 (!%p388_p10), %v1352_v0  ;;  %vm739_vm2 = vcmask (!%p388_p10), 64512  }
  0x1c   : > { %s1481_s27 = scalar_select %p238_p11, %s1330_s11, %s240_s25  }
  0x1d   : > { %1069 = vmatprep.mubr.msk.f32.mxu0 (!%p388_p10), %vm1353_vm0, %v1354_v1  ;;  %1080 = vmatprep.mubr.msk.f32.mxu1 (!%p388_p10), %vm1353_vm0, %v1354_v1  ;;  %s1701_s1 = sld [smem:[#allocation15_spill]] (!%p388_p10)  ;;  %s1702_s3 = sld [smem:[#allocation17_spill]] (!%p388_p10) }
  0x1e   : > { %1700 = sst [smem:[#allocation13_spill]] %s1481_s27  ;;  %s1703_s0 = sld [smem:[#allocation14_spill]] (!%p388_p10) }
  0x1f   : > { %s1686_s15 = sand.u32 (!%p388_p10), 1, %s1326_s10   ;;  %s1035_s18 = sshll.u32 (!%p388_p10), %s1338_s13, 2 }
  0x20   : > { %s1704_s2 = sld [smem:[#allocation16_spill]] (!%p388_p10)  ;;  %s1705_s4 = sld [smem:[#allocation18_spill]] (!%p388_p10) }
  0x22   : > { %s1486_s28 = scalar_select %p466_p12, %s1334_s12, 3 }
  0x23   : > { %s460_s29 = scalar_select %p459_p13, %s1338_s13, 1 }
  0x24   : > { %s1043_s21 = sshll.u32 %s1486_s28, 5  ;;  %s1706_s13 = sadd.s32 4294967295, %s1350_s16  }
  0x25   : > { %s470_s26 = scalar_lea.vmem %s1701_s1, %s1043_s21  ;;  %s478_s20 = scalar_lea.vmem %s1702_s3, %s1043_s21 }
  0x26   : > { %v491_v2 = vld [vmem:[%s470_s26] sm:$0xff]  ;;  %v492_v3 = vld [vmem:[%s470_s26 + $0x8] sm:$0xff]  ;;  %v493_v4 = vld [vmem:[%s470_s26 + $0x10] sm:$0xff]  ;;  %s486_s14 = scalar_lea.vmem %s1675_s5, %s1043_s21  ;;  %s1019_s27 = sshll.u32 %s460_s29, 3 }
  0x27   : > { %v1095_v5 = vpack.c.bf16 %v492_v3, %v491_v2  ;;  %v494_v6 = vld [vmem:[%s470_s26 + $0x18] sm:$0xff]  ;;  %v576_v7 = vld [vmem:[%s478_s20] sm:$0xff]  ;;  %v577_v8 = vld [vmem:[%s478_s20 + $0x8] sm:$0xff]  ;;  %s465_s17 = scalar_lea.vmem %s1703_s0, %s1019_s27  ;;  %s473_s27 = scalar_lea.vmem %s1704_s2, %s1486_s28 }
  0x28   : > { %v1101_v9 = vpack.c.bf16 %v577_v8, %v576_v7  ;;  %v1098_v10 = vpack.c.bf16 %v494_v6, %v493_v4  ;;  %v578_v11 = vld [vmem:[%s478_s20 + $0x10] sm:$0xff]  ;;  %v579_v12 = vld [vmem:[%s478_s20 + $0x18] sm:$0xff]  ;;  %v657_v13 = vld [vmem:[%s486_s14] sm:$0xff]  ;;  %s1513_s29 = sshll.u32 %s1686_s15, 3  ;;  %s481_s24 = scalar_lea.vmem %s1705_s4, %s1486_s28 }
  0x29   : > { %1096 = vmatpush3.bf16.msra.mxu0 %v1095_v5  ;;  %v658_v14 = vld [vmem:[%s486_s14 + $0x8] sm:$0xff]  ;;  %v1104_v15 = vpack.c.bf16 %v579_v12, %v578_v11  ;;  %v490_v16 = vld [vmem:[%s465_s17] sm:$0xff]  ;;  %v659_v18 = vld [vmem:[%s486_s14 + $0x10] sm:$0xff]  ;;  %s1526_s1 = sand.u32 1, %s1706_s13   ;;  %s451_s20 = scalar_lea.vmem [#allocation4], %s1513_s29 }
  0x2a   : > { %1097 = vmatprep.subr.bf16.mxu0 %v1352_v0  ;;  %1102 = vmatpush3.bf16.msra.mxu1 %v1101_v9  ;;  %v1107_v17 = vpack.c.bf16 %v658_v14, %v657_v13  ;;  %v660_v19 = vld [vmem:[%s486_s14 + $0x18] sm:$0xff]  ;;  %s766_s14 = sadd.s32 %s1334_s12, %s1035_s18  ;;  %v1026_v21 = vld [vmem:[%s473_s27] ss:$0 sm:$0xff]  ;;  %s786_s15 = sshll.u32 %s451_s20, 4  ;;  %s1540_s15 = int_to_ptr.vmem [resolvable:$true] %s786_s15 }
  0x2b   : > { %1103 = vmatprep.subr.bf16.mxu1 %v1352_v0  ;;  %v1110_v20 = vpack.c.bf16 %v660_v19, %v659_v18  ;;  %s1528_s19 = sshll.u32 %s766_s14, 7  ;;  %v1028_v22 = vld [vmem:[%s481_s24] ss:$0 sm:$0xff]  ;;  %s1687_s12 = scalar_lea.vmem [#allocation2], %s1513_s29 }
  0x2c   : > { %s770_s18 = sshll.u32 %s1687_s12, 4  ;;  %s1538_s14 = scalar_lea.hbm %s1678_s8, %s1528_s19  ;;  %s1548_s18 = int_to_ptr.vmem [resolvable:$true] %s770_s18 }
  0x2d   : > { %1099 = vmatpush3.bf16.msra.mxu0 %v1098_v10  ;;  %s1546_s25 = scalar_lea.hbm %s1677_s7, %s1528_s19  ;;  %s1688_s17 = scalar_lea.vmem [#allocation6], %s1513_s29 }
  0x2e   : > { %1106 = vmatprep.subr.bf16.mxu0 %v1352_v0  ;;  %1105 = vmatpush3.bf16.msra.mxu1 %v1104_v15  ;;  %s1554_s13 = sshll.u32 %s1688_s17, 4  ;;  %s1196_s21 = scalar_lea.vmem %s1540_s15, 128  ;;  %s803_s13 = int_to_ptr.vmem [resolvable:$true] %s1554_s13 }
  0x2f   : > { %p1197_p0 = scmp.ne.s32.totalorder %s1540_s15, %s1196_s21  ;;  %s1355_s0 = smov [#allocation4]  }
  0x30   : > { %1070 = vmatmul.mubr.msk.f32.vlgmr.msra.gmra.mrb[0].mxu0 %vm502_vm1, %v490_v16  ;;  %s1200_s12 = sshll.u32 %s1355_s0, 4  ;;  %s1201_s12 = int_to_ptr.vmem [resolvable:$false] %s1200_s12 }
  0x31   : > { %1108 = vmatpush3.bf16.msra.mxu0 %v1107_v17  ;;  %1081 = vmatmul.mubr.msk.f32.vlgmr.msra.gmra.mrb[0].mxu1 %vm502_vm1, %v490_v16  ;;  %p1198_p1 = pnand %p1197_p0, %p1461_p3  ;;  %s1202_s26 = scalar_lea.vmem %s1201_s12, 256 }
  0x32   : > { %1109 = vmatprep.subr.bf16.mxu0 %v1352_v0  ;;  %1091 = vmatprep.mubr.msk.f32.mxu0 %vm1353_vm0, %v1354_v1  ;;  %p1203_p4 = scmp.lt.s32.totalorder %s1540_s15, %s1201_s12  ;;  %p1204_p5 = scmp.lt.s32.totalorder %s1202_s26, %s1196_s21 }
  0x33   : > { %p1199_p2 = pneg %p1198_p1 }
  0x34   : > { %p1205_p6 = por %p1204_p5, %p1203_p4 }
  0x35   : > { %1111 = vmatpush3.bf16.msra.mxu0 %v1110_v20 }
  0x36   : > { %p1206_p7 = pnand %p1205_p6, %p1199_p2 }
  0x38   : > { %1092 = vmatmul.mubr.msk.f32.vlgmr.msra.gmra.mrb[2].mxu0 %vm502_vm1, %v490_v16 }
 0x103   : > { %v572_v23 = vpop.f32.mrb[0].mxu0 }
 0x104   : > { %v573_v24 = vadd.f32 %v1026_v21, %v572_v23  ;;  %v1071_v25 = vpop.f32.mrb[1].mxu0  ;;  %v653_v26 = vpop.f32.mrb[0].mxu1 }
 0x105   : > { %v654_v27 = vadd.f32 %v1028_v22, %v653_v26  ;;  %v1082_v28 = vpop.f32.mrb[1].mxu1 }
 0x106   : > { %v738_v29 = vmul.f32 0.35355338, %v573_v24 }
 0x107   : > { %741 = vst.msk [vmem:[%s451_s20] sm:$0xff] %vm739_vm2, %v654_v27 }
 0x108   : > { %1209 = shalt.err (!%p1206_p7)
}
 0x109   : > { %s1210_s20 = scalar_lea.hbm %s1538_s14, 128  ;;  %s1214_s0 = scalar_lea.hbm %s1678_s8, 1024 }
 0x10a   : > { %p1211_p9 = scmp.ne.s32.totalorder %s1538_s14, %s1210_s20  ;;  %p1215_p12 = scmp.lt.u32.totalorder %s1538_s14, %s1678_s8 }
 0x10b   : > { %p1216_p13 = scmp.lt.u32.totalorder %s1214_s0, %s1210_s20  ;;  %p1218_p1 = scmp.lt.u32.totalorder %s1210_s20, %s1538_s14 }
 0x10c   : > { %p1212_p10 = pnand %p1211_p9, %p1461_p3 }
 0x10d   : > { %p1217_p0 = por %p1216_p13, %p1215_p12 }
 0x10e   : > { %p1213_p11 = pneg %p1212_p10 }
 0x10f   : > { %p1219_p2 = por %p1218_p1, %p1217_p0 }
 0x111   : > { %p1220_p4 = pnand %p1219_p2, %p1213_p11 }
 0x113   : > { %1223 = shalt.err (!%p1220_p4)
}
 0x114   : > { %s1707_s21 = scalar_lea.sflag [#allocation5], %s1526_s1  ;;  %s1708_s17 = scalar_lea.vmem [#allocation2], %s1513_s29 }
 0x115   : > { %1113 = dma.vmem_to_hbm [thread:$0]  (%p1461_p3), %s1540_s15, 128, %s1538_s14, %s1707_s21   ;;  %740 = vst.msk [vmem:[%s1708_s17] sm:$0xff] %vm739_vm2, %v738_v29 }
 0x116   : > { %s1709_s20 = scalar_lea.vmem %s1676_s6, %s1486_s28  ;;  %s1710_s24 = sand.u32 1, %s1326_s10  }
 0x117   : > { %v1030_v30 = vld [vmem:[%s1709_s20] ss:$0 sm:$0xff]  ;;  %s744_s0 = scalar_lea.sflag [#allocation3], %s1710_s24  ;;  %s1224_s12 = scalar_lea.vmem %s1548_s18, 128 }
 0x118   : > { %p1225_p5 = scmp.ne.s32.totalorder %s1548_s18, %s1224_s12  ;;  %s1356_s2 = smov [#allocation2]  }
 0x119   : > { %s1228_s3 = sshll.u32 %s1356_s2, 4  ;;  %s1229_s3 = int_to_ptr.vmem [resolvable:$false] %s1228_s3 }
 0x11a   : > { %p1226_p6 = pnand %p1225_p5, %p1461_p3  ;;  %s1230_s4 = scalar_lea.vmem %s1229_s3, 256 }
 0x11b   : > { %p1231_p9 = scmp.lt.s32.totalorder %s1548_s18, %s1229_s3  ;;  %p1232_p10 = scmp.lt.s32.totalorder %s1230_s4, %s1224_s12 }
 0x11c   : > { %p1227_p7 = pneg %p1226_p6 }
 0x11d   : > { %p1233_p11 = por %p1232_p10, %p1231_p9 }
 0x11f   : > { %p1234_p12 = pnand %p1233_p11, %p1227_p7 }
 0x121   : > { %1237 = shalt.err (!%p1234_p12)
}
 0x122   : > { %s1238_s28 = scalar_lea.hbm %s1546_s25, 128  ;;  %s1242_s2 = scalar_lea.hbm %s1677_s7, 1024 }
 0x123   : > { %p1239_p13 = scmp.ne.s32.totalorder %s1546_s25, %s1238_s28  ;;  %p1243_p2 = scmp.lt.u32.totalorder %s1546_s25, %s1677_s7 }
 0x124   : > { %p1244_p4 = scmp.lt.u32.totalorder %s1242_s2, %s1238_s28  ;;  %p1246_p6 = scmp.lt.u32.totalorder %s1238_s28, %s1546_s25 }
 0x125   : > { %p1240_p0 = pnand %p1239_p13, %p1461_p3 }
 0x126   : > { %p1245_p5 = por %p1244_p4, %p1243_p2 }
 0x127   : > { %p1241_p1 = pneg %p1240_p0 }
 0x128   : > { %p1247_p7 = por %p1246_p6, %p1245_p5 }
 0x12a   : > { %p1248_p9 = pnand %p1247_p7, %p1241_p1 }
 0x12c   : > { %1251 = shalt.err (!%p1248_p9)
}
 0x12d   : > { %1112 = dma.vmem_to_hbm [thread:$0]  (%p1461_p3), %s1548_s18, 128, %s1546_s25, %s744_s0   ;;  %v734_v31 = vpop.f32.mrb[2].mxu0 }
 0x12e   : > { %v735_v32 = vadd.f32 %v1030_v30, %v734_v31  ;;  %v1093_v33 = vpop.f32.mrb[3].mxu0  ;;  %s1615_s27 = scalar_lea.hbm %s1679_s9, %s1528_s19  ;;  %s1711_s26 = scalar_lea.vmem [#allocation6], %s1513_s29 }
 0x12f   : > { %s1252_s20 = scalar_lea.vmem %s803_s13, 128  ;;  %s1357_s24 = smov [#allocation6]  }
 0x130   : > { %742 = vst.msk [vmem:[%s1711_s26] sm:$0xff] %vm739_vm2, %v735_v32  ;;  %p1253_p10 = scmp.ne.s32.totalorder %s803_s13, %s1252_s20  ;;  %s1256_s12 = sshll.u32 %s1357_s24, 4  ;;  %s1257_s12 = int_to_ptr.vmem [resolvable:$false] %s1256_s12 }
 0x131   : > { %s1258_s18 = scalar_lea.vmem %s1257_s12, 256  ;;  %p1259_p13 = scmp.lt.s32.totalorder %s803_s13, %s1257_s12 }
 0x132   : > { %p1254_p11 = pnand %p1253_p10, %p1461_p3  ;;  %p1260_p0 = scmp.lt.s32.totalorder %s1258_s18, %s1252_s20 }
 0x134   : > { %p1255_p12 = pneg %p1254_p11  ;;  %p1261_p1 = por %p1260_p0, %p1259_p13 }
 0x136   : > { %p1262_p2 = pnand %p1261_p1, %p1255_p12 }
 0x138   : > { %1265 = shalt.err (!%p1262_p2)
}
 0x139   : > { %s1266_s29 = scalar_lea.hbm %s1615_s27, 128  ;;  %s1270_s0 = scalar_lea.hbm %s1679_s9, 1024 }
 0x13a   : > { %p1267_p4 = scmp.ne.s32.totalorder %s1615_s27, %s1266_s29  ;;  %p1271_p7 = scmp.lt.u32.totalorder %s1615_s27, %s1679_s9 }
 0x13b   : > { %p1272_p9 = scmp.lt.u32.totalorder %s1270_s0, %s1266_s29  ;;  %p1274_p11 = scmp.lt.u32.totalorder %s1266_s29, %s1615_s27 }
 0x13c   : > { %p1268_p5 = pnand %p1267_p4, %p1461_p3 }
 0x13d   : > { %p1273_p10 = por %p1272_p9, %p1271_p7 }
 0x13e   : > { %p1269_p6 = pneg %p1268_p5 }
 0x13f   : > { %p1275_p12 = por %p1274_p11, %p1273_p10 }
 0x141   : > { %p1276_p13 = pnand %p1275_p12, %p1269_p6 }
 0x143   : > { %1279 = shalt.err (!%p1276_p13)
}
 0x144   : > { %s1712_s14 = scalar_lea.sflag [#allocation5], %s1526_s1 }
 0x145   : > { %1114 = dma.vmem_to_hbm [thread:$0]  (%p1461_p3), %s803_s13, 128, %s1615_s27, %s1712_s14  }
 0x146 PF: > { %p1128_p0 = scmp.ge.s32.totalorder %s1350_s16, 2  ;;  %s814_s2 = sand.u32 1, %s1322_s30  }
 0x147   : > { %s815_s21 = scalar_lea.sflag [#allocation3], %s814_s2 }
 0x148   : > { %p1119_p1 = pnand %p1128_p0, %p1472_p8 }
 0x14a   : > { %1313 = dma.done.wait (!%p1119_p1), %s815_s21, 128  }
 0x14b   : > { %1315 = vsyncadd (!%p1119_p1), %s815_s21, 4294967168  ;;  %s1713_s3 = sadd.s32 4294967294, %s1350_s16  }
 0x14c   : > { %s823_s4 = sand.u32 1, %s1713_s3  }
 0x14d   : > { %s824_s17 = scalar_lea.sflag [#allocation5], %s823_s4 }
 0x14e   : > { %1317 = dma.done.wait (!%p1119_p1), %s824_s17, 256  }
 0x14f   : > { %1319 = vsyncadd (!%p1119_p1), %s824_s17, 4294967040  ;;  %s26_s16 = sadd.s32 1, %s1350_s16   ;;  %s1714_s1 = sld [smem:[#allocation13_spill]] }
 0x150   : > { %p23_p3 = scmp.ge.s32.totalorder %s26_s16, 10   ;;  %s1715_s12 = sld [smem:[#allocation9_spill]] }
 0x151   : > { %s1716_s13 = sld [smem:[#allocation10_spill]]  ;;  %s1717_s14 = sld [smem:[#allocation11_spill]] }
 0x152   : > { %s1718_s15 = sld [smem:[#allocation12_spill]]  ;;  %s1719_s30 = smov %s1326_s10 }
 0x153   : > { %s1720_s10 = smov %s1330_s11  ;;  %25 = sbr.rel (!%p23_p3) target bundleno = 13 (0xd), region = 133 }
 0x155   : > { %s1721_s11 = smov %s1714_s1 }
 0x15a   :  { %838 = vsyncpa [#allocation3], 1 }
 0x15b   :  { %840 = vsyncpa [#allocation3 + $0x1], 1 }
 0x15c   :  { %841 = vsyncpa [#allocation5], 1 }
 0x15d   :  { %843 = vsyncpa [#allocation5 + $0x1], 1 }

</bundles_post_ra>
